<compile_context>
chip_gen: v7x
topology: tpu7x:2x2x1
jax: 0.10.0
libtpu: 0.0.40
codegen_flags: <defaults>
</compile_context>

<pallas_src>
import functools
import math

import jax
import jax.numpy as jnp
from jax.experimental import pallas as pl
from jax.experimental.pallas import tpu as pltpu

_INV_LN2 = 1.4426950408889634  # 1 / ln(2)

# Packed-component indices (lane of the (N,8) column pack / sublane of (8,N)).
_C_PRED, _C_LABEL, _C_G, _C_DINV = 0, 1, 2, 3


def _round_up(x, m):
    return ((x + m - 1) // m) * m


def _lambdarank_tile_kernel(col_ref, row_ref, out_ref, acc_ref, *, log2_eps):
    """One (T, T) tile of the pairwise LambdaRank loss, accumulated over j."""
    j = pl.program_id(1)

    @pl.when(j == 0)
    def _():
        acc_ref[...] = jnp.zeros_like(acc_ref)

    cols = col_ref[...]                      # (T, 8) column pack (varies with i)
    rows = row_ref[...]                      # (8, T) row pack    (varies with j)
    t = rows.shape[1]

    yps_c = cols[:, _C_PRED:_C_PRED + 1]     # sigma-pre-scaled scores, (T, 1)
    tsp_c = cols[:, _C_LABEL:_C_LABEL + 1]   # labels (NaN where invalid)
    g_c = cols[:, _C_G:_C_G + 1]
    dinv_c = cols[:, _C_DINV:_C_DINV + 1]
    yps_r = rows[_C_PRED:_C_PRED + 1, :]     # (1, T)
    tsp_r = rows[_C_LABEL:_C_LABEL + 1, :]
    g_r = rows[_C_G:_C_G + 1, :]
    dinv_r = rows[_C_DINV:_C_DINV + 1, :]

    # padded_pairs_mask & ndcg@k mask & isfinite folded into one compare:
    # invalid positions (padding, >= k, non-finite labels) carry NaN labels,
    # and both `NaN - x > 0` and `x - NaN > 0` are False.
    mask = (tsp_c - tsp_r) > 0.0

    # lambdaRank scheme: |D_i^-1 - D_j^-1| * |G_i - G_j|  (>= 0)
    weights = jnp.abs(dinv_c - dinv_r) * jnp.abs(g_c - g_r)

    # Log-space rewrite of log2(clamp(clamp(sigmoid(sigma*sd), eps)**w, eps)):
    #   max(w * max(-softplus(-sigma*sd)/ln2, log2 eps), log2 eps)   (w >= 0)
    # Scores were pre-scaled by sigma in the wrapper, so z = -sigma*sd is a sub.
    z = yps_r - yps_c
    softplus = jnp.maximum(z, 0.0) + jnp.log1p(jnp.exp(-jnp.abs(z)))
    log2_p = jnp.maximum(-softplus * _INV_LN2, log2_eps)
    losses = jnp.maximum(weights * log2_p, log2_eps)

    masked = jnp.where(mask, losses, 0.0)
    # VPU-only partial reduction onto an (8, T) accumulator; the reshape only
    # splits the sublane-major axis on a multiple of 8, so it is layout-free.
    acc_ref[...] += masked.reshape(t // 8, 8, t).sum(axis=0)

    # Single XLU reduce + one lane-dense (8,128) writeback per row-tile.
    @pl.when(j == pl.num_programs(1) - 1)
    def _():
        out_ref[...] = jnp.broadcast_to(
            jnp.sum(acc_ref[...], keepdims=True), out_ref.shape)


def lambdarank_loss(preds, labels, k=None, eps=1e-10, mu=10.0, sigma=1.0,
                    tile=None):
    """JAX/Pallas equivalent of LambdaRankLoss.forward for 1-D preds/labels."""
    del mu  # unused by the reference scheme as well
    preds = jnp.asarray(preds, jnp.float32)
    labels = jnp.asarray(labels, jnp.float32)
    n = preds.shape[0]
    k_lim = n if k is None else int(min(max(int(k), 0), n))
    if k_lim == 0:
        return jnp.float32(0.0)

    # ---- glue (plain JAX): sort, gather, DCG normalizers -------------------
    # TODO(synk): no in-kernel sort primitive; argsort/gather stay in XLA.
    order = jnp.argsort(-preds)                      # descending sort by preds
    y_pred_sorted = preds[order]
    true_sorted_by_preds = labels[order]             # labels gathered by pred order
    y_true_sorted = -jnp.sort(-labels)               # labels sorted descending

    tsp_clamped = jnp.maximum(true_sorted_by_preds, 0.0)
    yts_clamped = jnp.maximum(y_true_sorted, 0.0)

    pos_idxs = jnp.arange(1, n + 1, dtype=jnp.float32)
    D = jnp.log2(1.0 + pos_idxs)
    D_inv = 1.0 / D

    max_dcg = jnp.maximum(jnp.sum(((2.0 ** yts_clamped - 1.0) / D)[:k_lim]), eps)
    G = (2.0 ** tsp_clamped - 1.0) / max_dcg

    # NaN scrub once on the O(N) score vector; fold sigma in so the kernel's
    # z = -sigma*(s_i - s_j) is a plain subtraction (1 fewer VALU op / elem).
    yps = jnp.where(jnp.isnan(y_pred_sorted), 0.0, y_pred_sorted)
    yps_scaled = jnp.float32(sigma) * yps

    # Labels feed only the pair mask; non-finite labels (allRank-style padded
    # values) map to NaN so the kernel's single `> 0` compare excludes them.
    labels_masked = jnp.where(jnp.isfinite(true_sorted_by_preds),
                              true_sorted_by_preds, jnp.nan)

    # ---- generation-aware tile sizing ---------------------------------------
    if tile is None:
        try:
            info = pltpu.get_tpu_info()
            vmem_bytes = int(getattr(info, "vmem_capacity_bytes", 64 << 20))
        except Exception:
            vmem_bytes = 64 << 20
        big_vmem = vmem_bytes >= (100 << 20)   # v5e/v6e: 128 MiB, v7x: 64 MiB
        tile = 1024 if big_vmem else 512       # amortize ~0.35us/step overhead
        if not big_vmem and k_lim > 256:
            # v7x has 2 TensorCores: keep >= 2 row tiles so the "parallel"
            # grid axis actually shards work across both cores.
            tile = min(tile, _round_up((k_lim + 1) // 2, 128))

    # ---- top-k folded into the grid: only positions < k participate --------
    t = _round_up(int(min(tile, _round_up(k_lim, 128))), 128)
    n_pad = _round_up(k_lim, t)
    nt = n_pad // t

    def pad(v, fill=0.0):
        return jnp.pad(v[:k_lim], (0, n_pad - k_lim), constant_values=fill)

    zeros = jnp.zeros((n_pad,), jnp.float32)
    comps = [
        pad(yps_scaled),                       # _C_PRED  (pre-scaled by sigma)
        pad(labels_masked, fill=jnp.nan),      # _C_LABEL (NaN == invalid pos)
        pad(G),                                # _C_G
        pad(D_inv),                            # _C_DINV
        zeros, zeros, zeros, zeros,            # pad component count to 8
    ]
    # TODO(synk): the (n_pad, 8) column pack is lane-sparse in VMEM ((t,8)
    # blocks pad to (t,128)); a lane-dense variant needs an in-kernel
    # transpose of the (8,t) row pack, skipped here for lowering robustness.
    packed_cols = jnp.stack(comps, axis=1)     # (n_pad, 8)
    packed_rows = jnp.stack(comps, axis=0)     # (8, n_pad)

    kernel = functools.partial(_lambdarank_tile_kernel,
                               log2_eps=float(math.log2(eps)))

    vmem_limit = (64 << 20) if t >= 1024 else (32 << 20)

    out = pl.pallas_call(
        kernel,
        out_shape=jax.ShapeDtypeStruct((nt * 8, 128), jnp.float32),
        grid_spec=pltpu.PrefetchScalarGridSpec(
            num_scalar_prefetch=0,
            grid=(nt, nt),                     # (row-tile i, col-tile j), j last
            in_specs=[
                pl.BlockSpec((t, 8), lambda i, j: (i, 0)),   # column pack
                pl.BlockSpec((8, t), lambda i, j: (0, j)),   # row pack
            ],
            out_specs=pl.BlockSpec((8, 128), lambda i, j: (i, 0)),
            scratch_shapes=[pltpu.VMEM((8, t), jnp.float32)],
        ),
        compiler_params=pltpu.CompilerParams(
            dimension_semantics=("parallel", "arbitrary"),
            vmem_limit_bytes=vmem_limit,
        ),
    )(packed_cols, packed_rows)

    # One partial sum per row-tile lives in block rows [8i, 8i+8); reduce, negate.
    return -jnp.sum(out[0::8, 0])


def _reference_loss(preds, labels, k=None, eps=1e-10, sigma=1.0):
    """Pure-JAX reference mirroring the PyTorch forward (for sanity check)."""
    preds = preds.astype(jnp.float32)
    labels = labels.astype(jnp.float32)
    n = preds.shape[0]
    k_eff = n if k is None else k
    order = jnp.argsort(-preds)
    yps = preds[order]
    tsp = labels[order]
    yts = -jnp.sort(-labels)
    true_diffs = tsp[:, None] - tsp[None, :]
    pair_mask = jnp.isfinite(true_diffs) & (true_diffs > 0)
    km = (jnp.arange(n) < k_eff)
    ndcg_mask = km[:, None] & km[None, :]
    tsp_c = jnp.maximum(tsp, 0.0)
    yts_c = jnp.maximum(yts, 0.0)
    D = jnp.log2(1.0 + jnp.arange(1, n + 1, dtype=jnp.float32))
    max_dcg = jnp.maximum(jnp.sum(((2.0 ** yts_c - 1.0) / D)[:k_eff]), eps)
    G = (2.0 ** tsp_c - 1.0) / max_dcg
    weights = jnp.abs((1.0 / D)[:, None] - (1.0 / D)[None, :]) * \
        jnp.abs(G[:, None] - G[None, :])
    sd = jnp.clip(yps[:, None] - yps[None, :], -1e8, 1e8)
    sd = jnp.where(jnp.isnan(sd), 0.0, sd)
    wp = jnp.maximum(jnp.maximum(jax.nn.sigmoid(sigma * sd), eps) ** weights, eps)
    losses = jnp.log2(wp)
    return -jnp.sum(jnp.where(pair_mask & ndcg_mask, losses, 0.0))


if __name__ == "__main__":
    key = jax.random.PRNGKey(0)
    k1, k2, k3, k4 = jax.random.split(key, 4)

    # Single query (the PyTorch module adds the leading batch dim of 1 itself).
    n = 16
    preds = jax.random.normal(k1, (n,), dtype=jnp.float32)
    labels = jax.random.randint(k2, (n,), 0, 5).astype(jnp.float32)

    loss = lambdarank_loss(preds, labels, k=None)       # auto-tile path
    jax.block_until_ready(loss)
    ref = _reference_loss(preds, labels, k=None)
    assert jnp.allclose(loss, ref, rtol=1e-4, atol=1e-4), (loss, ref)

    # Top-k path (k-mask folded into the grid extent via NaN labels).
    loss_k = lambdarank_loss(preds, labels, k=8)
    jax.block_until_ready(loss_k)
    ref_k = _reference_loss(preds, labels, k=8)
    assert jnp.allclose(loss_k, ref_k, rtol=1e-4, atol=1e-4), (loss_k, ref_k)

    # Multi-tile path (forces a 3x3 grid of 128x128 tiles + accumulator loop).
    n2 = 300
    preds2 = jax.random.normal(k3, (n2,), dtype=jnp.float32)
    labels2 = jax.random.randint(k4, (n2,), 0, 5).astype(jnp.float32)
    loss2 = lambdarank_loss(preds2, labels2, k=None, tile=128)
    jax.block_until_ready(loss2)
    ref2 = _reference_loss(preds2, labels2, k=None)
    assert jnp.allclose(loss2, ref2, rtol=1e-3, atol=1e-3), (loss2, ref2)

    # Non-default sigma exercises the wrapper-side pre-scaling.
    loss3 = lambdarank_loss(preds2, labels2, k=150, sigma=1.7, tile=256)
    jax.block_until_ready(loss3)
    ref3 = _reference_loss(preds2, labels2, k=150, sigma=1.7)
    assert jnp.allclose(loss3, ref3, rtol=1e-3, atol=1e-3), (loss3, ref3)

    print("KERNEL_OK")
</pallas_src>

<mosaic_0001>
module attributes {stable_mosaic.version = 11 : i64} {
  func.func @_lambdarank_tile_kernel(%arg0: i32, %arg1: i32, %arg2: memref<128x8xf32, #tpu.memory_space<vmem>>, %arg3: memref<8x128xf32, #tpu.memory_space<vmem>>, %arg4: memref<8x128xf32, #tpu.memory_space<vmem>>, %arg5: memref<8x128xf32, #tpu.memory_space<vmem>>) attributes {dimension_semantics = [#tpu.dimension_semantics<parallel>, #tpu.dimension_semantics<arbitrary>], iteration_bounds = array<i64: 1, 1>, scalar_prefetch = 0 : i64, scratch_operands = 1 : i64, tpu.core_type = #tpu.core_type<tc>, window_params = [{transform_indices = @transform_0, window_bounds = array<i64: 128, 8>}, {transform_indices = @transform_1, window_bounds = array<i64: 8, 128>}, {transform_indices = @transform_2, window_bounds = array<i64: 8, 128>}]} {
    %c0_i32 = arith.constant 0 : i32
    %0 = arith.cmpi eq, %arg1, %c0_i32 : i32
    %1 = arith.extui %0 : i1 to i32
    %c0_i32_0 = arith.constant 0 : i32
    %2 = arith.cmpi ne, %1, %c0_i32_0 : i32
    scf.if %2 {
      %cst_18 = arith.constant 0.000000e+00 : f32
      %57 = vector.broadcast %cst_18 : f32 to vector<8x128xf32>
      %c0_19 = arith.constant 0 : index
      %c0_20 = arith.constant 0 : index
      %58 = vector.load %arg5[%c0_19, %c0_20] : memref<8x128xf32, #tpu.memory_space<vmem>>, vector<8x128xf32>
      tpu.vector_store %arg5[%c0_19, %c0_20], %57 {strides = array<i32>} : memref<8x128xf32, #tpu.memory_space<vmem>>, vector<8x128xf32>,
    } else {
    }
    %c0 = arith.constant 0 : index
    %c0_1 = arith.constant 0 : index
    %3 = vector.load %arg2[%c0, %c0_1] : memref<128x8xf32, #tpu.memory_space<vmem>>, vector<128x8xf32>
    %c0_2 = arith.constant 0 : index
    %c0_3 = arith.constant 0 : index
    %4 = vector.load %arg3[%c0_2, %c0_3] : memref<8x128xf32, #tpu.memory_space<vmem>>, vector<8x128xf32>
    %5 = vector.extract_strided_slice %3 {offsets = [0, 0], sizes = [128, 1], strides = [1, 1]} : vector<128x8xf32> to vector<128x1xf32>
    %6 = vector.extract_strided_slice %3 {offsets = [0, 1], sizes = [128, 1], strides = [1, 1]} : vector<128x8xf32> to vector<128x1xf32>
    %7 = vector.extract_strided_slice %3 {offsets = [0, 2], sizes = [128, 1], strides = [1, 1]} : vector<128x8xf32> to vector<128x1xf32>
    %8 = vector.extract_strided_slice %3 {offsets = [0, 3], sizes = [128, 1], strides = [1, 1]} : vector<128x8xf32> to vector<128x1xf32>
    %9 = vector.extract_strided_slice %4 {offsets = [0, 0], sizes = [1, 128], strides = [1, 1]} : vector<8x128xf32> to vector<1x128xf32>
    %10 = vector.extract_strided_slice %4 {offsets = [1, 0], sizes = [1, 128], strides = [1, 1]} : vector<8x128xf32> to vector<1x128xf32>
    %11 = vector.extract_strided_slice %4 {offsets = [2, 0], sizes = [1, 128], strides = [1, 1]} : vector<8x128xf32> to vector<1x128xf32>
    %12 = vector.extract_strided_slice %4 {offsets = [3, 0], sizes = [1, 128], strides = [1, 1]} : vector<8x128xf32> to vector<1x128xf32>
    %13 = vector.broadcast %6 : vector<128x1xf32> to vector<128x128xf32>
    %14 = vector.broadcast %10 : vector<1x128xf32> to vector<128x128xf32>
    %15 = arith.subf %13, %14 : vector<128x128xf32>
    %cst = arith.constant 0.000000e+00 : f32
    %16 = vector.broadcast %cst : f32 to vector<128x128xf32>
    %17 = arith.cmpf ogt, %15, %16 : vector<128x128xf32>
    %18 = vector.broadcast %8 : vector<128x1xf32> to vector<128x128xf32>
    %19 = vector.broadcast %12 : vector<1x128xf32> to vector<128x128xf32>
    %20 = arith.subf %18, %19 : vector<128x128xf32>
    %21 = math.absf %20 : vector<128x128xf32>
    %22 = vector.broadcast %7 : vector<128x1xf32> to vector<128x128xf32>
    %23 = vector.broadcast %11 : vector<1x128xf32> to vector<128x128xf32>
    %24 = arith.subf %22, %23 : vector<128x128xf32>
    %25 = math.absf %24 : vector<128x128xf32>
    %26 = arith.mulf %21, %25 : vector<128x128xf32>
    %27 = vector.broadcast %9 : vector<1x128xf32> to vector<128x128xf32>
    %28 = vector.broadcast %5 : vector<128x1xf32> to vector<128x128xf32>
    %29 = arith.subf %27, %28 : vector<128x128xf32>
    %cst_4 = arith.constant 0.000000e+00 : f32
    %30 = vector.broadcast %cst_4 : f32 to vector<128x128xf32>
    %31 = arith.maximumf %29, %30 : vector<128x128xf32>
    %32 = math.absf %29 : vector<128x128xf32>
    %cst_5 = arith.constant 0.000000e+00 : f32
    %33 = vector.broadcast %cst_5 : f32 to vector<128x128xf32>
    %34 = arith.subf %33, %32 : vector<128x128xf32>
    %35 = math.exp %34 : vector<128x128xf32>
    %36 = math.log1p %35 : vector<128x128xf32>
    %37 = arith.addf %31, %36 : vector<128x128xf32>
    %cst_6 = arith.constant 0.000000e+00 : f32
    %38 = vector.broadcast %cst_6 : f32 to vector<128x128xf32>
    %39 = arith.subf %38, %37 : vector<128x128xf32>
    %cst_7 = arith.constant 1.44269502 : f32
    %40 = vector.broadcast %cst_7 : f32 to vector<128x128xf32>
    %41 = arith.mulf %39, %40 : vector<128x128xf32>
    %cst_8 = arith.constant -33.2192802 : f32
    %42 = vector.broadcast %cst_8 : f32 to vector<128x128xf32>
    %43 = arith.maximumf %41, %42 : vector<128x128xf32>
    %44 = arith.mulf %26, %43 : vector<128x128xf32>
    %cst_9 = arith.constant -33.2192802 : f32
    %45 = vector.broadcast %cst_9 : f32 to vector<128x128xf32>
    %46 = arith.maximumf %44, %45 : vector<128x128xf32>
    %cst_10 = arith.constant 0.000000e+00 : f32
    %47 = vector.broadcast %cst_10 : f32 to vector<128x128xf32>
    %48 = arith.select %17, %46, %47 : vector<128x128xi1>, vector<128x128xf32>
    %c0_11 = arith.constant 0 : index
    %c0_12 = arith.constant 0 : index
    %49 = vector.load %arg5[%c0_11, %c0_12] : memref<8x128xf32, #tpu.memory_space<vmem>>, vector<8x128xf32>
    %50 = vector.shape_cast %48 : vector<128x128xf32> to vector<16x8x128xf32>
    %cst_13 = arith.constant dense<0.000000e+00> : vector<8x128xf32>
    %51 = vector.multi_reduction <add>, %50, %cst_13 [0] : vector<16x8x128xf32> to vector<8x128xf32>
    %52 = arith.addf %49, %51 : vector<8x128xf32>
    %c0_14 = arith.constant 0 : index
    %c0_15 = arith.constant 0 : index
    %53 = vector.load %arg5[%c0_14, %c0_15] : memref<8x128xf32, #tpu.memory_space<vmem>>, vector<8x128xf32>
    tpu.vector_store %arg5[%c0_14, %c0_15], %52 {strides = array<i32>} : memref<8x128xf32, #tpu.memory_space<vmem>>, vector<8x128xf32>,
    %c0_i32_16 = arith.constant 0 : i32
    %54 = arith.cmpi eq, %arg1, %c0_i32_16 : i32
    %55 = arith.extui %54 : i1 to i32
    %c0_i32_17 = arith.constant 0 : i32
    %56 = arith.cmpi ne, %55, %c0_i32_17 : i32
    scf.if %56 {
      %c0_18 = arith.constant 0 : index
      %c0_19 = arith.constant 0 : index
      %57 = vector.load %arg5[%c0_18, %c0_19] : memref<8x128xf32, #tpu.memory_space<vmem>>, vector<8x128xf32>
      %58 = vector.shape_cast %57 : vector<8x128xf32> to vector<1x8x128xf32>
      %cst_20 = arith.constant dense<0.000000e+00> : vector<1xf32>
      %59 = vector.multi_reduction <add>, %58, %cst_20 [1, 2] : vector<1x8x128xf32> to vector<1xf32>
      %60 = vector.shape_cast %59 : vector<1xf32> to vector<1x1x1xf32>
      %61 = vector.extract %60[0, 0, 0] : f32 from vector<1x1x1xf32>
      %62 = vector.broadcast %61 : f32 to vector<1x1xf32>
      %63 = vector.shape_cast %62 : vector<1x1xf32> to vector<1x1xf32>
      %64 = vector.broadcast %63 : vector<1x1xf32> to vector<8x128xf32>
      %c0_21 = arith.constant 0 : index
      %c0_22 = arith.constant 0 : index
      %65 = vector.load %arg4[%c0_21, %c0_22] : memref<8x128xf32, #tpu.memory_space<vmem>>, vector<8x128xf32>
      tpu.vector_store %arg4[%c0_21, %c0_22], %64 {strides = array<i32>} : memref<8x128xf32, #tpu.memory_space<vmem>>, vector<8x128xf32>,
    } else {
    }
    return
  }
  func.func @transform_0(%arg0: i32, %arg1: i32) -> (i32, i32) {
    %c0_i32 = arith.constant 0 : i32
    %c0_i32_0 = arith.constant 0 : i32
    return %arg0, %c0_i32 : i32, i32
  }
  func.func @transform_1(%arg0: i32, %arg1: i32) -> (i32, i32) {
    %c0_i32 = arith.constant 0 : i32
    %c0_i32_0 = arith.constant 0 : i32
    return %c0_i32, %arg1 : i32, i32
  }
  func.func @transform_2(%arg0: i32, %arg1: i32) -> (i32, i32) {
    %c0_i32 = arith.constant 0 : i32
    %c0_i32_0 = arith.constant 0 : i32
    return %arg0, %c0_i32 : i32, i32
  }
}

</mosaic_0001>

<bundles_post_ra>
// kernel: tpu_custom_call.1
= control target key start
LH: loop header
LB: loop body
LE: loop exit
PB: predicated region body
PF: predicated region fallthrough
CT: control target
= control target key end

     0   :  { %v962_v2 = vmov 0   ;;  %s1642_s0 = inlined_call_operand.vmem [shape: f32[128,8], index: 0, kind: input, shape index: {}]   ;;  %s1643_s1 = inlined_call_operand.vmem [shape: f32[8,128], index: 1, kind: input, shape index: {}]   ;;  %s1644_s2 = inlined_call_operand.hbm [shape: f32[8,128], index: 2, kind: output, shape index: {}]  }
   0x1   :  { %v985_v0 = vld [vmem:[%s1642_s0 + $0x10] sm:$0xff]  ;;  %v17_v1 = vld [vmem:[%s1642_s0] sm:$0xff]  ;;  %841 = vset.pattern.permute.xlu1 %v962_v2  ;;  %840 = vset.pattern.permute.xlu0 %v962_v2  ;;  %v20_v3 = vld [vmem:[%s1642_s0 + $0x18] sm:$0xff] }
   0x2   :  { %379 = vperm.xlu1 %841, %v985_v0   ;;  %371 = vperm.xlu0 %840, %v17_v1   ;;  %v18_v4 = vld [vmem:[%s1642_s0 + $0x8] sm:$0xff] }
   0x3   :  { %7 = vsyncpa [#allocation4], 0  ;;  %v1002_v5 = vld [vmem:[%s1642_s0 + $0x28] sm:$0xff]  ;;  %v21_v6 = vld [vmem:[%s1642_s0 + $0x20] sm:$0xff]  ;;  %v963_v17 = vmov 3   ;;  %v964_v18 = vmov 2   ;;  %v114_v20 = vlaneseq }
   0x4   :  { %v1011_v7 = vld [vmem:[%s1642_s0 + $0x38] sm:$0xff]  ;;  %v1016_v8 = vld [vmem:[%s1642_s0 + $0x30] sm:$0xff]  ;;  %v1023_v9 = vld [vmem:[%s1642_s0 + $0x48] sm:$0xff]  ;;  %v965_v19 = vmov 1  }
   0x5   :  { %v25_v10 = vld [vmem:[%s1642_s0 + $0x40] sm:$0xff]  ;;  %v1032_v11 = vld [vmem:[%s1642_s0 + $0x58] sm:$0xff]  ;;  %v1037_v12 = vld [vmem:[%s1642_s0 + $0x50] sm:$0xff]  ;;  %v1112_v23 = vshrl.u32 %v114_v20, 7 }
   0x6   :  { %383 = vperm.xlu1 %841, %v20_v3   ;;  %375 = vperm.xlu0 %840, %v18_v4   ;;  %v1044_v13 = vld [vmem:[%s1642_s0 + $0x68] sm:$0xff]  ;;  %v1049_v14 = vld [vmem:[%s1642_s0 + $0x60] sm:$0xff]  ;;  %v1056_v15 = vld [vmem:[%s1642_s0 + $0x78] sm:$0xff] }
   0x7   :  { %v1061_v16 = vld [vmem:[%s1642_s0 + $0x70] sm:$0xff]  ;;  %v368_v26 = vsub.s32 0, %v1112_v23  ;;  %v1120_v27 = vld [vmem:[%s1643_s1] sm:$0xff]  ;;  %s966_s1 = smov [#allocation3]  }
   0x8   :  { %s825_s14 = sshll.u32 %s966_s1, 4  ;;  %s826_s14 = int_to_ptr.vmem [resolvable:$true] %s825_s14 }
   0x9   :  { %v1125_v30 = vrot.slane %v1120_v27, %v368_v26  ;;  %s938_s16 = scalar_lea.vmem %s826_s14, 128  ;;  %p943_p1 = scmp.lt.s32.totalorder %s826_s14, %s826_s14 }
   0xa   :  { %391 = vperm.xlu1 %841, %v1002_v5   ;;  %387 = vperm.xlu0 %840, %v21_v6   ;;  %p939_p0 = scmp.ne.s32.totalorder %s826_s14, %s938_s16  ;;  %p944_p2 = scmp.lt.s32.totalorder %s938_s16, %s938_s16 }
   0xc   :  { %p945_p3 = por %p944_p2, %p943_p1 }
   0xe   :  { %399 = vperm.xlu1 %841, %v1011_v7   ;;  %395 = vperm.xlu0 %840, %v1016_v8   ;;  %p946_p4 = pnand %p945_p3, %p939_p0 }
  0x12   :  { %407 = vperm.xlu1 %841, %v1023_v9   ;;  %403 = vperm.xlu0 %840, %v25_v10  }
  0x16   :  { %415 = vperm.xlu1 %841, %v1032_v11   ;;  %411 = vperm.xlu0 %840, %v1037_v12  }
  0x1a   :  { %423 = vperm.xlu1 %841, %v1044_v13   ;;  %419 = vperm.xlu0 %840, %v1049_v14  }
  0x1e   :  { %431 = vperm.xlu1 %841, %v1056_v15   ;;  %427 = vperm.xlu0 %840, %v1061_v16  }
  0x22   :  { %843 = vset.pattern.permute.xlu1 %v963_v17  ;;  %842 = vset.pattern.permute.xlu0 %v963_v17 }
  0x23   :  { %155 = vperm.xlu1 %843, %v18_v4   ;;  %151 = vperm.xlu0 %842, %v17_v1  }
  0x27   :  { %844 = vset.pattern.permute.xlu1 %v964_v18  ;;  %163 = vperm.xlu0 %842, %v20_v3  }
  0x28   :  { %251 = vperm.xlu1 %844, %v17_v1  }
  0x2b   :  { %171 = vperm.xlu0 %842, %v1002_v5  }
  0x2c   :  { %845 = vset.pattern.permute.xlu1 %v963_v17 }
  0x2d   :  { %159 = vperm.xlu1 %845, %v985_v0  }
  0x2f   :  { %175 = vperm.xlu0 %842, %v1016_v8  }
  0x31   :  { %846 = vset.pattern.permute.xlu1 %v964_v18 }
  0x32   :  { %259 = vperm.xlu1 %846, %v985_v0  }
  0x33   :  { %852 = vset.pattern.permute.xlu0 %v965_v19 }
  0x34   :  { %51 = vperm.xlu0 %852, %v20_v3  }
  0x36   :  { %263 = vperm.xlu1 %846, %v20_v3  }
  0x38   :  { %56 = vperm.xlu0 %852, %v21_v6  }
  0x3a   :  { %847 = vset.pattern.permute.xlu1 %v963_v17 }
  0x3b   :  { %167 = vperm.xlu1 %847, %v21_v6  }
  0x3c   :  { %76 = vperm.xlu0 %852, %v25_v10  }
  0x3f   :  { %848 = vset.pattern.permute.xlu1 %v965_v19 }
  0x40   :  { %36 = vperm.xlu1 %848, %v17_v1   ;;  %81 = vperm.xlu0 %852, %v1023_v9  }
  0x44   :  { %41 = vperm.xlu1 %848, %v18_v4   ;;  %864 = vset.pattern.permute.xlu0 %v964_v18 }
  0x45   :  { %255 = vperm.xlu0 %864, %v18_v4  }
  0x48   :  { %849 = vset.pattern.permute.xlu1 %v964_v18 }
  0x49   :  { %271 = vperm.xlu1 %849, %v1002_v5   ;;  %267 = vperm.xlu0 %864, %v21_v6  }
  0x4d   :  { %850 = vset.pattern.permute.xlu1 %v965_v19  ;;  %283 = vperm.xlu0 %864, %v25_v10  }
  0x4e   :  { %46 = vperm.xlu1 %850, %v985_v0  }
  0x51   :  { %287 = vperm.xlu0 %864, %v1023_v9  }
  0x52   :  { %851 = vset.pattern.permute.xlu1 %v964_v18 }
  0x53   :  { %275 = vperm.xlu1 %851, %v1016_v8  }
  0x55   :  { %303 = vperm.xlu0 %864, %v1044_v13  }
  0x57   :  { %853 = vset.pattern.permute.xlu1 %v963_v17 }
  0x58   :  { %179 = vperm.xlu1 %853, %v1011_v7  }
  0x59   :  { %307 = vperm.xlu0 %864, %v1061_v16  }
  0x5c   :  { %854 = vset.pattern.permute.xlu1 %v964_v18 }
  0x5d   :  { %279 = vperm.xlu1 %854, %v1011_v7   ;;  %868 = vset.pattern.permute.xlu0 %v963_v17 }
  0x5e   :  { %191 = vperm.xlu0 %868, %v1037_v12  }
  0x61   :  { %855 = vset.pattern.permute.xlu1 %v963_v17 }
  0x62   :  { %183 = vperm.xlu1 %855, %v25_v10   ;;  %195 = vperm.xlu0 %868, %v1032_v11  }
  0x66   :  { %856 = vset.pattern.permute.xlu1 %v965_v19  ;;  %211 = vperm.xlu0 %868, %v1056_v15  }
  0x67   :  { %61 = vperm.xlu1 %856, %v1002_v5  }
  0x6a   :  { %872 = vset.pattern.permute.xlu0 %v965_v19 }
  0x6b   :  { %857 = vset.pattern.permute.xlu1 %v963_v17  ;;  %101 = vperm.xlu0 %872, %v1044_v13  }
  0x6c   :  { %187 = vperm.xlu1 %857, %v1023_v9  }
  0x6f   :  { %873 = vset.pattern.permute.xlu0 %v962_v2 }
  0x70   :  { %858 = vset.pattern.permute.xlu1 %v965_v19 }
  0x71   :  { %66 = vperm.xlu1 %858, %v1016_v8  }
  0x75   :  { %859 = vset.pattern.permute.xlu1 %v964_v18 }
  0x76   :  { %291 = vperm.xlu1 %859, %v1037_v12  }
  0x7a   :  { %860 = vset.pattern.permute.xlu1 %v965_v19 }
  0x7b   :  { %71 = vperm.xlu1 %860, %v1011_v7  }
  0x7f   :  { %861 = vset.pattern.permute.xlu1 %v964_v18 }
  0x80   :  { %295 = vperm.xlu1 %861, %v1032_v11  }
  0x81   :  { %v380_v21 = vpop.permute.xlu1 %379  ;;  %v372_v22 = vpop.permute.xlu0 %371 }
  0x82   :  { %v1129_v33 = vsub.f32 %v1125_v30, %v372_v22  ;;  %v1133_v34 = vsub.f32 %v1125_v30, %v380_v21 }
  0x84   :  { %862 = vset.pattern.permute.xlu1 %v963_v17  ;;  %v466_v39 = vand.u32 2147483647, %v1129_v33  ;;  %v468_v40 = vand.u32 2147483647, %v1133_v34 }
  0x85   :  { %v384_v24 = vpop.permute.xlu1 %383  ;;  %199 = vperm.xlu1 %862, %v1049_v14   ;;  %v376_v25 = vpop.permute.xlu0 %375 }
  0x86   :  { %v1136_v35 = vsub.f32 %v1125_v30, %v384_v24  ;;  %v1143_v38 = vsub.f32 %v1125_v30, %v376_v25  ;;  %v482_v45 = vsub.f32 0.0, %v466_v39  ;;  %v484_v47 = vsub.f32 0.0, %v468_v40 }
  0x87   :  { %v216_v24 = vsub.s32 3, %v1112_v23  ;;  %v316_v25 = vsub.s32 2, %v1112_v23 }
  0x88   :  { %v469_v41 = vand.u32 2147483647, %v1136_v35  ;;  %v467_v44 = vand.u32 2147483647, %v1143_v38  ;;  %v498_v53 = vmul.f32 1.442695, %v482_v45 }
  0x89   :  { %v392_v28 = vpop.permute.xlu1 %391  ;;  %863 = vset.pattern.permute.xlu1 %v964_v18  ;;  %v388_v29 = vpop.permute.xlu0 %387  ;;  %v502_v55 = vmul.f32 1.442695, %v484_v47 }
  0x8a   :  { %299 = vperm.xlu1 %863, %v1049_v14   ;;  %v1156_v46 = vsub.f32 %v1125_v30, %v392_v28  ;;  %v1159_v48 = vsub.f32 %v1125_v30, %v388_v29  ;;  %v485_v49 = vsub.f32 0.0, %v469_v41  ;;  %v483_v52 = vsub.f32 0.0, %v467_v44 }
  0x8b   :  { %874 = vpow2.f32 %v498_v53  ;;  %v116_v29 = vsub.s32 1, %v1112_v23  ;;  %v1232_v41 = vrot.slane %v1120_v27, %v216_v24  ;;  %v1235_v23 = vrot.slane %v1120_v27, %v316_v25 }
  0x8c   :  { %v471_v54 = vand.u32 2147483647, %v1156_v46  ;;  %v470_v56 = vand.u32 2147483647, %v1159_v48  ;;  %v504_v57 = vmul.f32 1.442695, %v485_v49  ;;  %876 = vpow2.f32 %v502_v55 }
  0x8d   :  { %v400_v31 = vpop.permute.xlu1 %399  ;;  %v396_v32 = vpop.permute.xlu0 %395  ;;  %v500_v60 = vmul.f32 1.442695, %v483_v52  ;;  %v1242_v47 = vrot.slane %v1120_v27, %v116_v29 }
  0x8e   :  { %865 = vset.pattern.permute.xlu1 %v963_v17  ;;  %v487_v61 = vsub.f32 0.0, %v471_v54  ;;  %v486_v62 = vsub.f32 0.0, %v470_v56  ;;  %878 = vpow2.f32 %v504_v57  ;;  %v1182_v3 = vsub.f32 %v1125_v30, %v400_v31 }
  0x8f   :  { %203 = vperm.xlu1 %865, %v1044_v13   ;;  %880 = vpow2.f32 %v500_v60  ;;  %v1185_v4 = vsub.f32 %v1125_v30, %v396_v32 }
  0x90   :  { %v508_v1 = vmul.f32 1.442695, %v487_v61  ;;  %v506_v2 = vmul.f32 1.442695, %v486_v62  ;;  %v473_v8 = vand.u32 2147483647, %v1182_v3 }
  0x91   :  { %v1138_v36 = vpop.permute.xlu1 %407  ;;  %v1140_v37 = vpop.permute.xlu0 %403 }
  0x92   :  { %882 = vpow2.f32 %v508_v1  ;;  %v1224_v32 = vsub.f32 %v1125_v30, %v1138_v36 }
  0x93   :  { %866 = vset.pattern.permute.xlu1 %v965_v19  ;;  %884 = vpow2.f32 %v506_v2 }
  0x94   :  { %86 = vperm.xlu1 %866, %v1037_v12   ;;  %1646 = vst [vmem:[#allocation6_spill] sm:$0xff] %v1224_v32  ;;  %v475_v54 = vand.u32 2147483647, %v1224_v32 }
  0x95   :  { %v1150_v42 = vpop.permute.xlu1 %415  ;;  %v1152_v43 = vpop.permute.xlu0 %411 }
  0x96   :  { %v1193_v7 = vpop.eup %874 }
  0x97   :  { %v1196_v9 = vpop.eup %876  ;;  %v530_v13 = vadd.f32 1.0, %v1193_v7  ;;  %v533_v45 = vmul.f32 -0.5, %v1193_v7  ;;  %v536_v1 = vand.u32 2147483647, %v1193_v7 }
  0x98   :  { %867 = vset.pattern.permute.xlu1 %v963_v17  ;;  %v1198_v10 = vpop.eup %878  ;;  %v551_v52 = vmul.f32 -0.5, %v1196_v9  ;;  %v554_v27 = vand.u32 2147483647, %v1196_v9 }
  0x99   :  { %v1162_v50 = vpop.permute.xlu1 %423  ;;  %207 = vperm.xlu1 %867, %v1061_v16   ;;  %v1165_v51 = vpop.permute.xlu0 %419  ;;  %886 = vlog2.f32 %v530_v13  ;;  %v534_v62 = vadd.f32 1.0, %v533_v45  ;;  %v560_v13 = vmul.f32 -0.5, %v1198_v10  ;;  %v563_v24 = vand.u32 2147483647, %v1198_v10 }
  0x9a   :  { %v1201_v12 = vpop.eup %880  ;;  %vm1267_vm0 = vcmp.lt.f32.partialorder %v554_v27, 0.0004427343  ;;  %vm1274_vm1 = vcmp.lt.f32.partialorder %v536_v1, 0.0004427343 }
  0x9b   :  { %v539_v21 = vadd.f32 1.0, %v1201_v12  ;;  %v542_v60 = vmul.f32 -0.5, %v1201_v12  ;;  %v535_v2 = vmul.f32 %v1193_v7, %v534_v62  ;;  %vm1283_vm2 = vcmp.lt.f32.partialorder %v563_v24, 0.0004427343 }
  0x9c   :  { %v1289_v62 = vsub.f32 %v1125_v30, %v1150_v42 }
  0x9d   :  { %v1169_v58 = vpop.permute.xlu1 %431  ;;  %869 = vset.pattern.permute.xlu1 %v965_v19  ;;  %v1172_v59 = vpop.permute.xlu0 %427  ;;  %v543_v45 = vadd.f32 1.0, %v542_v60 }
  0x9e   :  { %91 = vperm.xlu1 %869, %v1032_v11   ;;  %v472_v11 = vand.u32 2147483647, %v1185_v4  ;;  %v477_v61 = vand.u32 2147483647, %v1289_v62 }
  0xa0   :  { %v488_v22 = vsub.f32 0.0, %v472_v11  ;;  %v552_v11 = vadd.f32 1.0, %v551_v52 }
  0xa2   :  { %v1175_v63 = vpop.permute.xlu1 %155  ;;  %870 = vset.pattern.permute.xlu1 %v964_v18  ;;  %v1178_v0 = vpop.permute.xlu0 %151  ;;  %v489_v18 = vsub.f32 0.0, %v473_v8  ;;  %v510_v39 = vmul.f32 1.442695, %v488_v22  ;;  %v553_v27 = vmul.f32 %v1196_v9, %v552_v11  ;;  %v544_v11 = vmul.f32 %v1201_v12, %v543_v45 }
  0xa3   :  { %311 = vperm.xlu1 %870, %v1056_v15  }
  0xa4   :  { %v512_v26 = vmul.f32 1.442695, %v489_v18  ;;  %v491_v18 = vsub.f32 0.0, %v475_v54 }
  0xa6   :  { %v1191_v6 = vpop.permute.xlu0 %163  ;;  %v516_v60 = vmul.f32 1.442695, %v491_v18 }
  0xa7   :  { %871 = vset.pattern.permute.xlu1 %v965_v19  ;;  %v1188_v5 = vpop.permute.xlu1 %251  ;;  %v557_v19 = vadd.f32 1.0, %v1198_v10 }
  0xa8   :  { %96 = vperm.xlu1 %871, %v1049_v14   ;;  %v548_v14 = vadd.f32 1.0, %v1196_v9 }
  0xaa   :  { %v1209_v20 = vpop.permute.xlu0 %171  ;;  %888 = vlog2.f32 %v548_v14 }
  0xab   :  { %890 = vlog2.f32 %v557_v19 }
  0xac   :  { %106 = vperm.xlu1 %871, %v1061_v16   ;;  %v1205_v17 = vpop.permute.xlu1 %159  ;;  %v1215_v16 = vpop.eup %882  ;;  %892 = vlog2.f32 %v539_v21 }
  0xad   :  { %v1220_v31 = vpop.eup %884  ;;  %v575_v40 = vadd.f32 1.0, %v1215_v16  ;;  %894 = vpow2.f32 %v512_v26  ;;  %v561_v26 = vadd.f32 1.0, %v560_v13  ;;  %v581_v42 = vand.u32 2147483647, %v1215_v16 }
  0xae   :  { %v1237_v44 = vpop.permute.xlu0 %175  ;;  %v566_v36 = vadd.f32 1.0, %v1220_v31  ;;  %896 = vpow2.f32 %v510_v39  ;;  %v887_v8 = vpop.eup %886  ;;  %v569_v25 = vmul.f32 -0.5, %v1220_v31  ;;  %v572_v49 = vand.u32 2147483647, %v1220_v31 }
  0xaf   :  { %898 = vlog2.f32 %v575_v40  ;;  %v532_v14 = vmul.f32 0.6931472, %v887_v8  ;;  %vm1322_vm4 = vcmp.lt.f32.partialorder %v581_v42, 0.0004427343  ;;  %v1662_v13 = vmax.f32 %v1143_v38, 0.0 }
  0xb0   :  { %111 = vperm.xlu1 %871, %v1056_v15   ;;  %v1228_v15 = vsub.f32 %v1125_v30, %v1140_v37  ;;  %900 = vlog2.f32 %v566_v36  ;;  %v545_v36 = vand.u32 2147483647, %v1201_v12  ;;  %v570_v12 = vadd.f32 1.0, %v569_v25 }
  0xb1   :  { %v1217_v28 = vpop.permute.xlu1 %259  ;;  %v538_v24 = vsel %vm1274_vm1, %v535_v2, %v532_v14  ;;  %902 = vpow2.f32 %v516_v60  ;;  %v1655_v14 = vmax.f32 %v1129_v33, 0.0  ;;  %vm1326_vm5 = vcmp.lt.f32.partialorder %v572_v49, 0.0004427343 }
  0xb2   :  { %v474_v57 = vand.u32 2147483647, %v1228_v15  ;;  %vm1294_vm3 = vcmp.lt.f32.partialorder %v545_v36, 0.0004427343  ;;  %v1660_v33 = vmax.f32 %v1133_v34, 0.0  ;;  %v1341_v49 = vsub.f32 %v1125_v30, %v1152_v43 }
  0xb3   :  { %v1260_v19 = vpop.permute.xlu0 %51  ;;  %v318_v38 = vsub.f32 %v1188_v5, %v1235_v23  ;;  %v320_v43 = vsub.f32 %v1217_v28, %v1235_v23  ;;  %v1663_v28 = vmax.f32 %v1156_v46, 0.0 }
  0xb4   :  { %v889_v22 = vpop.eup %888  ;;  %v490_v29 = vsub.f32 0.0, %v474_v57  ;;  %v578_v57 = vmul.f32 -0.5, %v1215_v16 }
  0xb5   :  { %v1244_v37 = vpop.permute.xlu1 %263  ;;  %v891_v39 = vpop.eup %890  ;;  %v550_v55 = vmul.f32 0.6931472, %v889_v22 }
  0xb6   :  { %v893_v54 = vpop.eup %892  ;;  %v514_v7 = vmul.f32 1.442695, %v490_v29  ;;  %v559_v8 = vmul.f32 0.6931472, %v891_v39  ;;  %v579_v29 = vadd.f32 1.0, %v578_v57  ;;  %v674_v57 = vadd.f32 %v538_v24, %v1655_v14 }
  0xb7   :  { %v1281_v56 = vpop.eup %894  ;;  %v541_v9 = vmul.f32 0.6931472, %v893_v54  ;;  %v1298_v18 = vpop.permute.xlu0 %56  ;;  %v562_v54 = vmul.f32 %v1198_v10, %v561_v26  ;;  %v556_v53 = vsel %vm1267_vm0, %v553_v27, %v550_v55  ;;  %v1664_v27 = vmax.f32 %v1159_v48, 0.0 }
  0xb8   :  { %v1300_v22 = vpop.eup %896  ;;  %v593_v45 = vadd.f32 1.0, %v1281_v56  ;;  %v596_v32 = vmul.f32 -0.5, %v1281_v56  ;;  %904 = vpow2.f32 %v514_v7  ;;  %v580_v55 = vmul.f32 %v1215_v16, %v579_v29 }
  0xb9   :  { %v899_v39 = vpop.eup %898  ;;  %v565_v10 = vsel %vm1283_vm2, %v562_v54, %v559_v8  ;;  %v547_v25 = vsel %vm1294_vm3, %v544_v11, %v541_v9  ;;  %v584_v26 = vadd.f32 1.0, %v1300_v22  ;;  %v676_v52 = vadd.f32 %v556_v53, %v1660_v33 }
  0xba   :  { %v1262_v21 = vpop.permute.xlu1 %167  ;;  %v901_v36 = vpop.eup %900  ;;  %v577_v40 = vmul.f32 0.6931472, %v899_v39  ;;  %v571_v8 = vmul.f32 %v1220_v31, %v570_v12  ;;  %906 = vlog2.f32 %v593_v45  ;;  %v1661_v11 = vmax.f32 %v1136_v35, 0.0 }
  0xbb   :  { %v568_v7 = vmul.f32 0.6931472, %v901_v36  ;;  %v1333_v9 = vpop.permute.xlu0 %76  ;;  %v675_v24 = vadd.f32 %v547_v25, %v1662_v13  ;;  %v493_v29 = vsub.f32 0.0, %v477_v61  ;;  %v690_v42 = vsub.f32 0.0, %v674_v57  ;;  %v1365_v5 = vpop.eup %902 }
  0xbc   :  { %v677_v16 = vadd.f32 %v565_v10, %v1661_v11  ;;  %v597_v34 = vadd.f32 1.0, %v596_v32  ;;  %v599_v53 = vand.u32 2147483647, %v1281_v56  ;;  %908 = vlog2.f32 %v584_v26 }
  0xbd   :  { %v583_v39 = vsel %vm1322_vm4, %v580_v55, %v577_v40  ;;  %v218_v35 = vsub.f32 %v1178_v0, %v1232_v41  ;;  %v692_v54 = vsub.f32 0.0, %v676_v52  ;;  %v574_v32 = vsel %vm1326_vm5, %v571_v8, %v568_v7 }
  0xbe   :  { %v587_v12 = vmul.f32 -0.5, %v1300_v22  ;;  %v220_v45 = vsub.f32 %v1205_v17, %v1232_v41  ;;  %v693_v36 = vsub.f32 0.0, %v677_v16  ;;  %v691_v61 = vsub.f32 0.0, %v675_v24 }
  0xbf   :  { %v1291_v1 = vpop.permute.xlu1 %36  ;;  %v1359_v14 = vmul.f32 1.442695, %v493_v29  ;;  %v1363_v0 = vsub.f32 %v1125_v30, %v1162_v50  ;;  %v679_v57 = vadd.f32 %v583_v39, %v1663_v28  ;;  %v590_v10 = vand.u32 2147483647, %v1300_v22  ;;  %v1372_v17 = vpop.permute.xlu0 %81 }
  0xc0   :  { %v221_v25 = vsub.f32 %v1191_v6, %v1232_v41  ;;  %v336_v26 = vand.u32 2147483647, %v320_v43  ;;  %v706_v55 = vmul.f32 1.442695, %v690_v42  ;;  %v678_v50 = vadd.f32 %v574_v32, %v1664_v27 }
  0xc1   :  { %v234_v60 = vand.u32 2147483647, %v218_v35  ;;  %v334_v33 = vand.u32 2147483647, %v318_v38  ;;  %v1380_v46 = vmul.f32 1.442695, %v692_v54  ;;  %v598_v7 = vmul.f32 %v1281_v56, %v597_v34 }
  0xc2   :  { %v1374_v40 = vpop.eup %904  ;;  %vm1383_vm6 = vcmp.lt.f32.partialorder %v599_v53, 0.0004427343  ;;  %v588_v6 = vadd.f32 1.0, %v587_v12  ;;  %v236_v11 = vand.u32 2147483647, %v220_v45  ;;  %v611_v48 = vadd.f32 1.0, %v1365_v5 }
  0xc3   :  { %v1312_v2 = vpop.permute.xlu1 %41  ;;  %v709_v16 = vmul.f32 1.442695, %v693_v36  ;;  %v1387_v13 = vmul.f32 1.442695, %v691_v61  ;;  %v614_v24 = vmul.f32 -0.5, %v1365_v5  ;;  %v695_v42 = vsub.f32 0.0, %v679_v57 }
  0xc4   :  { %v907_v29 = vpop.eup %906  ;;  %v237_v39 = vand.u32 2147483647, %v221_v25  ;;  %v1391_v35 = vmul.f32 %v336_v26, %v236_v11  ;;  %v321_v56 = vsub.f32 %v1244_v37, %v1235_v23  ;;  %v722_v34 = vmax.f32 %v706_v55, -33.21928  ;;  %v256_v61 = vpop.permute.xlu0 %255 }
  0xc5   :  { %v694_v53 = vsub.f32 0.0, %v678_v50  ;;  %v602_v38 = vadd.f32 1.0, %v1374_v40  ;;  %v350_v43 = vmul.f32 %v334_v33, %v234_v60  ;;  %v724_v32 = vmax.f32 %v1380_v46, -33.21928 }
  0xc6   :  { %v909_v54 = vpop.eup %908  ;;  %v589_v12 = vmul.f32 %v1300_v22, %v588_v6  ;;  %vm1398_vm7 = vcmp.lt.f32.partialorder %v590_v10, 0.0004427343  ;;  %v337_v36 = vand.u32 2147483647, %v321_v56  ;;  %v595_v57 = vmul.f32 0.6931472, %v907_v29 }
  0xc7   :  { %910 = vlog2.f32 %v611_v48  ;;  %v615_v37 = vadd.f32 1.0, %v614_v24  ;;  %v617_v25 = vand.u32 2147483647, %v1365_v5  ;;  %v725_v26 = vmax.f32 %v709_v16, -33.21928 }
  0xc8   :  { %v1344_v31 = vpop.permute.xlu1 %271  ;;  %v723_v55 = vmax.f32 %v1387_v13, -33.21928  ;;  %v1406_v27 = vmul.f32 1.442695, %v695_v42  ;;  %v353_v50 = vmul.f32 %v337_v36, %v237_v39  ;;  %v1408_v22 = vmul.f32 1.442695, %v694_v53  ;;  %v268_v8 = vpop.permute.xlu0 %267 }
  0xc9   :  { %912 = vlog2.f32 %v602_v38  ;;  %v118_v10 = vsub.f32 %v1291_v1, %v1242_v47  ;;  %v738_v60 = vmul.f32 %v722_v34, %v350_v43  ;;  %v586_v33 = vmul.f32 0.6931472, %v909_v54 }
  0xca   :  { %v605_v46 = vmul.f32 -0.5, %v1374_v40  ;;  %v476_v6 = vand.u32 2147483647, %v1341_v49  ;;  %v1414_v11 = vmul.f32 %v725_v26, %v353_v50  ;;  %v601_v16 = vsel %vm1383_vm6, %v598_v7, %v595_v57 }
  0xcb   :  { %v1419_v13 = vmul.f32 %v1365_v5, %v615_v37  ;;  %vm134_vm8 = vcmp.gt.f32.partialorder %v118_v10, 0.0  ;;  %v754_v48 = vmax.f32 %v738_v60, -33.21928  ;;  %v608_v1 = vand.u32 2147483647, %v1374_v40 }
  0xcc   :  { %v219_v29 = vsub.f32 %v1175_v63, %v1232_v41  ;;  %v223_v42 = vsub.f32 %v1209_v20, %v1232_v41  ;;  %v222_v39 = vsub.f32 %v1262_v21, %v1232_v41  ;;  %v727_v7 = vmax.f32 %v1406_v27, -33.21928 }
  0xcd   :  { %v1378_v52 = vpop.permute.xlu1 %46  ;;  %v726_v5 = vmax.f32 %v1408_v22, -33.21928  ;;  %914 = vpow2.f32 %v1359_v14  ;;  %v770_v56 = vsel %vm134_vm8, %v754_v48, 0.0  ;;  %v1669_v34 = vmax.f32 %v1182_v3, 0.0 }
  0xce   :  { %v592_v63 = vsel %vm1398_vm7, %v589_v12, %v586_v33  ;;  %v606_v38 = vadd.f32 1.0, %v605_v46  ;;  %v492_v20 = vsub.f32 0.0, %v476_v6  ;;  %v479_v43 = vand.u32 2147483647, %v1363_v0 }
  0xcf   :  { %v1435_v53 = vadd.f32 %v601_v16, %v1669_v34  ;;  %v319_v21 = vsub.f32 %v256_v61, %v1235_v23  ;;  %v323_v54 = vsub.f32 %v1344_v31, %v1235_v23  ;;  %v322_v36 = vsub.f32 %v268_v8, %v1235_v23 }
  0xd0   :  { %v1446_v14 = vsub.f32 %v1125_v30, %v1165_v51  ;;  %v235_v3 = vand.u32 2147483647, %v219_v29  ;;  %v239_v57 = vand.u32 2147483647, %v223_v42  ;;  %v238_v37 = vand.u32 2147483647, %v222_v39 }
  0xd1   :  { %v911_v12 = vpop.eup %910  ;;  %v1670_v26 = vmax.f32 %v1185_v4, 0.0  ;;  %vm1454_vm9 = vcmp.lt.f32.partialorder %v617_v25, 0.0004427343  ;;  %v335_v31 = vand.u32 2147483647, %v319_v21  ;;  %v697_v51 = vsub.f32 0.0, %v1435_v53 }
  0xd2   :  { %v1402_v28 = vpop.permute.xlu1 %275  ;;  %v339_v50 = vand.u32 2147483647, %v323_v54  ;;  %v338_v22 = vand.u32 2147483647, %v322_v36  ;;  %vm1459_vm10 = vcmp.lt.f32.partialorder %v608_v1, 0.0004427343  ;;  %v740_v60 = vmul.f32 %v724_v32, %v1391_v35 }
  0xd3   :  { %v1452_v27 = vadd.f32 %v592_v63, %v1670_v26  ;;  %v120_v4 = vsub.f32 %v1378_v52, %v1242_v47  ;;  %v913_v33 = vpop.eup %912  ;;  %v607_v25 = vmul.f32 %v1374_v40, %v606_v38  ;;  %v518_v46 = vmul.f32 1.442695, %v492_v20 }
  0xd4   :  { %v351_v6 = vmul.f32 %v335_v31, %v235_v3  ;;  %v354_v16 = vmul.f32 %v338_v22, %v238_v37  ;;  %v495_v48 = vsub.f32 0.0, %v479_v43  ;;  %v478_v29 = vand.u32 2147483647, %v1446_v14  ;;  %v1676_v22 = vld [vmem:[#allocation6_spill] sm:$0xff] }
  0xd5   :  { %v1470_v1 = vsub.f32 %v1125_v30, %v1172_v59  ;;  %v119_v42 = vsub.f32 %v1312_v2, %v1242_v47  ;;  %v696_v35 = vsub.f32 0.0, %v1452_v27  ;;  %v1477_v52 = vsub.f32 %v1125_v30, %v1169_v58 }
  0xd6   :  { %v739_v40 = vmul.f32 %v723_v55, %v351_v6  ;;  %v355_v32 = vmul.f32 %v339_v50, %v239_v57  ;;  %v613_v8 = vmul.f32 0.6931472, %v911_v12  ;;  %v604_v34 = vmul.f32 0.6931472, %v913_v33 }
  0xd7   :  { %v1421_v24 = vpop.permute.xlu1 %179  ;;  %v121_v63 = vsub.f32 %v1260_v19, %v1242_v47  ;;  %vm136_vm11 = vcmp.gt.f32.partialorder %v120_v4, 0.0  ;;  %v1483_v59 = vpop.eup %914  ;;  %916 = vpow2.f32 %v518_v46  ;;  %v742_v38 = vmul.f32 %v726_v5, %v354_v16 }
  0xd8   :  { %v755_v2 = vmax.f32 %v739_v40, -33.21928  ;;  %v756_v20 = vmax.f32 %v740_v60, -33.21928  ;;  %v494_v43 = vsub.f32 0.0, %v478_v29  ;;  %v122_v58 = vsub.f32 %v1298_v18, %v1242_v47 }
  0xd9   :  { %v480_v30 = vand.u32 2147483647, %v1470_v1  ;;  %vm135_vm12 = vcmp.gt.f32.partialorder %v119_v42, 0.0  ;;  %v757_v55 = vmax.f32 %v1414_v11, -33.21928  ;;  %v743_v36 = vmul.f32 %v727_v7, %v355_v32 }
  0xda   :  { %v771_v21 = vsel %vm135_vm12, %v755_v2, 0.0  ;;  %v772_v54 = vsel %vm136_vm11, %v756_v20, 0.0  ;;  %v619_v19 = vsel %vm1454_vm9, %v1419_v13, %v613_v8  ;;  %v610_v5 = vsel %vm1459_vm10, %v607_v25, %v604_v34 }
  0xdb   :  { %vm137_vm13 = vcmp.gt.f32.partialorder %v121_v63, 0.0  ;;  %v787_v3 = vadd.f32 %v771_v21, %v770_v56  ;;  %v224_v37 = vsub.f32 %v1237_v44, %v1232_v41  ;;  %v758_v18 = vmax.f32 %v742_v38, -33.21928  ;;  %v284_v56 = vpop.permute.xlu0 %283 }
  0xdc   :  { %v1448_v45 = vpop.permute.xlu1 %279  ;;  %v324_v11 = vsub.f32 %v1402_v28, %v1235_v23  ;;  %v524_v7 = vmul.f32 1.442695, %v495_v48  ;;  %v481_v26 = vand.u32 2147483647, %v1477_v52  ;;  %vm138_vm14 = vcmp.gt.f32.partialorder %v122_v58, 0.0 }
  0xdd   :  { %v788_v13 = vadd.f32 %v787_v3, %v772_v54  ;;  %v1675_v27 = vmax.f32 %v1228_v15, 0.0  ;;  %v773_v31 = vsel %vm137_vm13, %v757_v55, 0.0  ;;  %v759_v50 = vmax.f32 %v743_v36, -33.21928 }
  0xde   :  { %v1677_v44 = vmax.f32 %v1676_v22, 0.0  ;;  %v522_v60 = vmul.f32 1.442695, %v494_v43  ;;  %v496_v4 = vsub.f32 0.0, %v480_v30  ;;  %v240_v33 = vand.u32 2147483647, %v224_v37 }
  0xdf   :  { %v682_v61 = vadd.f32 %v610_v5, %v1675_v27  ;;  %v789_v28 = vadd.f32 %v788_v13, %v773_v31  ;;  %v340_v25 = vand.u32 2147483647, %v324_v11  ;;  %v774_v46 = vsel %vm138_vm14, %v758_v18, 0.0  ;;  %v288_v63 = vpop.permute.xlu0 %287 }
  0xe0   :  { %v683_v10 = vadd.f32 %v619_v19, %v1677_v44  ;;  %v325_v48 = vsub.f32 %v1448_v45, %v1235_v23  ;;  %v326_v29 = vsub.f32 %v284_v56, %v1235_v23  ;;  %v713_v32 = vmul.f32 1.442695, %v697_v51 }
  0xe1   :  { %v1479_v39 = vpop.permute.xlu1 %183  ;;  %v790_v42 = vadd.f32 %v789_v28, %v774_v46  ;;  %v1509_v40 = vpop.eup %916  ;;  %v712_v8 = vmul.f32 1.442695, %v696_v35  ;;  %v698_v34 = vsub.f32 0.0, %v682_v61  ;;  %918 = vpow2.f32 %v524_v7 }
  0xe2   :  { %v226_v15 = vsub.f32 %v1479_v39, %v1232_v41  ;;  %v225_v2 = vsub.f32 %v1421_v24, %v1232_v41  ;;  %v327_v45 = vsub.f32 %v288_v63, %v1235_v23  ;;  %v699_v20 = vsub.f32 0.0, %v683_v10 }
  0xe3   :  { %920 = vpow2.f32 %v522_v60  ;;  %v497_v43 = vsub.f32 0.0, %v481_v26  ;;  %v526_v30 = vmul.f32 1.442695, %v496_v4  ;;  %v356_v58 = vmul.f32 %v340_v25, %v240_v33 }
  0xe4   :  { %v341_v55 = vand.u32 2147483647, %v325_v48  ;;  %v242_v53 = vand.u32 2147483647, %v226_v15  ;;  %v342_v51 = vand.u32 2147483647, %v326_v29  ;;  %v126_v60 = vsub.f32 %v1333_v9, %v1242_v47  ;;  %v1533_v15 = vpop.permute.xlu0 %303 }
  0xe5   :  { %v728_v21 = vmax.f32 %v712_v8, -33.21928  ;;  %v714_v54 = vmul.f32 1.442695, %v698_v34  ;;  %v620_v36 = vadd.f32 1.0, %v1509_v40  ;;  %922 = vpow2.f32 %v526_v30 }
  0xe6   :  { %v62_v57 = vpop.permute.xlu1 %61  ;;  %v241_v19 = vand.u32 2147483647, %v225_v2  ;;  %v343_v24 = vand.u32 2147483647, %v327_v45  ;;  %v715_v3 = vmul.f32 1.442695, %v699_v20  ;;  %v358_v11 = vmul.f32 %v342_v51, %v242_v53 }
  0xe7   :  { %v123_v12 = vsub.f32 %v62_v57, %v1242_v47  ;;  %v528_v57 = vmul.f32 1.442695, %v497_v43  ;;  %v629_v7 = vadd.f32 1.0, %v1483_v59  ;;  %924 = vlog2.f32 %v620_v36 }
  0xe8   :  { %v357_v18 = vmul.f32 %v341_v55, %v241_v19  ;;  %v729_v13 = vmax.f32 %v713_v32, -33.21928  ;;  %v730_v27 = vmax.f32 %v714_v54, -33.21928  ;;  %v731_v56 = vmax.f32 %v715_v3, -33.21928  ;;  %v1546_v51 = vpop.permute.xlu0 %307 }
  0xe9   :  { %vm139_vm15 = vcmp.gt.f32.partialorder %v123_v12, 0.0  ;;  %v744_v12 = vmul.f32 %v728_v21, %v356_v58  ;;  %926 = vpow2.f32 %v528_v57  ;;  %v623_v4 = vmul.f32 -0.5, %v1509_v40 }
  0xea   :  { %v775_v6 = vsel %vm139_vm15, %v759_v50, 0.0  ;;  %v746_v50 = vmul.f32 %v730_v27, %v358_v11  ;;  %v745_v44 = vmul.f32 %v729_v13, %v357_v18  ;;  %928 = vlog2.f32 %v629_v7 }
  0xeb   :  { %v188_v16 = vpop.permute.xlu1 %187  ;;  %v791_v38 = vadd.f32 %v790_v42, %v775_v6  ;;  %v1522_v31 = vpop.eup %918  ;;  %v760_v22 = vmax.f32 %v744_v12, -33.21928  ;;  %v127_v46 = vsub.f32 %v1372_v17, %v1242_v47  ;;  %vm142_vm1 = vcmp.gt.f32.partialorder %v126_v60, 0.0 }
  0xec   :  { %v227_v39 = vsub.f32 %v188_v16, %v1232_v41  ;;  %v647_v16 = vadd.f32 1.0, %v1522_v31  ;;  %v762_v48 = vmax.f32 %v746_v50, -33.21928  ;;  %v761_v29 = vmax.f32 %v745_v44, -33.21928  ;;  %v192_v12 = vpop.permute.xlu0 %191 }
  0xed   :  { %v1524_v10 = vpop.eup %920  ;;  %v624_v8 = vadd.f32 1.0, %v623_v4  ;;  %v626_v17 = vand.u32 2147483647, %v1509_v40  ;;  %vm143_vm3 = vcmp.gt.f32.partialorder %v127_v46, 0.0  ;;  %v632_v20 = vmul.f32 -0.5, %v1483_v59 }
  0xee   :  { %v243_v5 = vand.u32 2147483647, %v227_v39  ;;  %v638_v42 = vadd.f32 1.0, %v1524_v10  ;;  %930 = vlog2.f32 %v647_v16  ;;  %v778_v43 = vsel %vm142_vm1, %v762_v48, 0.0 }
  0xef   :  { %v1536_v32 = vpop.eup %922  ;;  %v625_v55 = vmul.f32 %v1509_v40, %v624_v8  ;;  %vm627_vm4 = vcmp.lt.f32.partialorder %v626_v17, 0.0004427343  ;;  %v633_v36 = vadd.f32 1.0, %v632_v20  ;;  %v650_v3 = vmul.f32 -0.5, %v1522_v31 }
  0xf0   :  { %v67_v35 = vpop.permute.xlu1 %66  ;;  %v359_v61 = vmul.f32 %v343_v24, %v243_v5  ;;  %932 = vlog2.f32 %v638_v42  ;;  %v656_v53 = vadd.f32 1.0, %v1536_v32  ;;  %v635_v24 = vand.u32 2147483647, %v1483_v59 }
  0xf1   :  { %v124_v37 = vsub.f32 %v67_v35, %v1242_v47  ;;  %v925_v2 = vpop.eup %924  ;;  %v460_v5 = vmax.f32 %v1341_v49, 0.0  ;;  %v641_v18 = vmul.f32 -0.5, %v1524_v10  ;;  %v634_v11 = vmul.f32 %v1483_v59, %v633_v36 }
  0xf2   :  { %v747_v28 = vmul.f32 %v731_v56, %v359_v61  ;;  %v622_v58 = vmul.f32 0.6931472, %v925_v2  ;;  %934 = vlog2.f32 %v656_v53  ;;  %vm1558_vm5 = vcmp.lt.f32.partialorder %v635_v24, 0.0004427343 }
  0xf3   :  { %vm140_vm0 = vcmp.gt.f32.partialorder %v124_v37, 0.0  ;;  %v1542_v30 = vpop.eup %926  ;;  %v651_v27 = vadd.f32 1.0, %v650_v3  ;;  %v642_v50 = vadd.f32 1.0, %v641_v18  ;;  %v659_v44 = vmul.f32 -0.5, %v1536_v32 }
  0xf4   :  { %v776_v33 = vsel %vm140_vm0, %v760_v22, 0.0  ;;  %v763_v34 = vmax.f32 %v747_v28, -33.21928  ;;  %v929_v21 = vpop.eup %928  ;;  %v665_v40 = vadd.f32 1.0, %v1542_v30  ;;  %v628_v37 = vsel %vm627_vm4, %v625_v55, %v622_v58 }
  0xf5   :  { %v1520_v26 = vpop.permute.xlu1 %291  ;;  %v792_v9 = vadd.f32 %v791_v38, %v776_v33  ;;  %v631_v57 = vmul.f32 0.6931472, %v929_v21  ;;  %v684_v13 = vadd.f32 %v628_v37, %v460_v5  ;;  %v644_v22 = vand.u32 2147483647, %v1524_v10 }
  0xf6   :  { %v779_v35 = vsel %vm143_vm3, %v763_v34, 0.0  ;;  %936 = vlog2.f32 %v665_v40  ;;  %v461_v60 = vmax.f32 %v1289_v62, 0.0  ;;  %v328_v4 = vsub.f32 %v1520_v26, %v1235_v23 }
  0xf7   :  { %v637_v56 = vsel %vm1558_vm5, %v634_v11, %v631_v57  ;;  %v228_v28 = vsub.f32 %v192_v12, %v1232_v41  ;;  %v653_v33 = vand.u32 2147483647, %v1522_v31  ;;  %v652_v48 = vmul.f32 %v1522_v31, %v651_v27 }
  0xf8   :  { %v931_v61 = vpop.eup %930  ;;  %v685_v46 = vadd.f32 %v637_v56, %v461_v60  ;;  %v643_v42 = vmul.f32 %v1524_v10, %v642_v50  ;;  %vm1575_vm6 = vcmp.lt.f32.partialorder %v644_v22, 0.0004427343  ;;  %v660_v62 = vadd.f32 1.0, %v659_v44 }
  0xf9   :  { %v649_v16 = vmul.f32 0.6931472, %v931_v61  ;;  %v344_v26 = vand.u32 2147483647, %v328_v4  ;;  %v244_v34 = vand.u32 2147483647, %v228_v28 }
  0xfa   :  { %v72_v25 = vpop.permute.xlu1 %71  ;;  %v933_v59 = vpop.eup %932  ;;  %vm1582_vm7 = vcmp.lt.f32.partialorder %v653_v33, 0.0004427343  ;;  %v668_v31 = vmul.f32 -0.5, %v1542_v30  ;;  %v662_v10 = vand.u32 2147483647, %v1536_v32  ;;  %v701_v20 = vsub.f32 0.0, %v685_v46 }
  0xfb   :  { %v125_v6 = vsub.f32 %v72_v25, %v1242_v47  ;;  %v196_v25 = vpop.permute.xlu0 %195  ;;  %v463_v58 = vmax.f32 %v1363_v0, 0.0  ;;  %v661_v53 = vmul.f32 %v1536_v32, %v660_v62  ;;  %v360_v36 = vmul.f32 %v344_v26, %v244_v34 }
  0xfc   :  { %v229_v2 = vsub.f32 %v196_v25, %v1232_v41  ;;  %v935_v17 = vpop.eup %934  ;;  %v669_v57 = vadd.f32 1.0, %v668_v31  ;;  %vm1595_vm8 = vcmp.lt.f32.partialorder %v662_v10, 0.0004427343  ;;  %v717_v0 = vmul.f32 1.442695, %v701_v20 }
  0xfd   :  { %vm141_vm2 = vcmp.gt.f32.partialorder %v125_v6, 0.0  ;;  %v700_v6 = vsub.f32 0.0, %v684_v13  ;;  %v658_v21 = vmul.f32 0.6931472, %v935_v17  ;;  %v464_v32 = vmax.f32 %v1470_v1, 0.0 }
  0xfe   :  { %v777_v63 = vsel %vm141_vm2, %v761_v29, 0.0  ;;  %v640_v29 = vmul.f32 0.6931472, %v933_v59  ;;  %v245_v5 = vand.u32 2147483647, %v229_v2  ;;  %v670_v50 = vmul.f32 %v1542_v30, %v669_v57 }
  0xff   :  { %v793_v45 = vadd.f32 %v792_v9, %v777_v63  ;;  %v1539_v39 = vpop.permute.xlu1 %295  ;;  %v664_v13 = vsel %vm1595_vm8, %v661_v53, %v658_v21  ;;  %v733_v44 = vmax.f32 %v717_v0, -33.21928 }
 0x100   :  { %v329_v63 = vsub.f32 %v1539_v39, %v1235_v23  ;;  %v462_v39 = vmax.f32 %v1446_v14, 0.0  ;;  %v646_v55 = vsel %vm1575_vm6, %v643_v42, %v640_v29  ;;  %v671_v14 = vand.u32 2147483647, %v1542_v30  ;;  %v212_v42 = vpop.permute.xlu0 %211 }
 0x101   :  { %v794_v38 = vadd.f32 %v793_v45, %v778_v43  ;;  %v716_v43 = vmul.f32 1.442695, %v700_v6  ;;  %v688_v33 = vadd.f32 %v664_v13, %v464_v32  ;;  %v331_v30 = vsub.f32 %v1533_v15, %v1235_v23 }
 0x102   :  { %v345_v24 = vand.u32 2147483647, %v329_v63  ;;  %v686_v11 = vadd.f32 %v646_v55, %v462_v39  ;;  %vm1605_vm9 = vcmp.lt.f32.partialorder %v671_v14, 0.0004427343 }
 0x103   :  { %v1548_v54 = vadd.f32 %v794_v38, %v779_v35  ;;  %v655_v38 = vsel %vm1582_vm7, %v652_v48, %v649_v16  ;;  %v937_v35 = vpop.eup %936  ;;  %v732_v18 = vmax.f32 %v716_v43, -33.21928  ;;  %v465_v48 = vmax.f32 %v1477_v52, 0.0 }
 0x104   :  { %v1550_v19 = vpop.permute.xlu1 %199  ;;  %v687_v40 = vadd.f32 %v655_v38, %v463_v58  ;;  %v667_v12 = vmul.f32 0.6931472, %v937_v35  ;;  %v361_v27 = vmul.f32 %v345_v24, %v245_v5  ;;  %v702_v4 = vsub.f32 0.0, %v686_v11  ;;  %v102_v24 = vpop.permute.xlu0 %101 }
 0x105   :  { %v748_v61 = vmul.f32 %v732_v18, %v360_v36  ;;  %v230_v25 = vsub.f32 %v1550_v19, %v1232_v41  ;;  %v704_v63 = vsub.f32 0.0, %v688_v33  ;;  %v347_v2 = vand.u32 2147483647, %v331_v30 }
 0x106   :  { %v703_v56 = vsub.f32 0.0, %v687_v40  ;;  %v673_v28 = vsel %vm1605_vm9, %v670_v50, %v667_v12  ;;  %v749_v6 = vmul.f32 %v733_v44, %v361_v27  ;;  %v718_v26 = vmul.f32 1.442695, %v702_v4 }
 0x107   :  { %v764_v46 = vmax.f32 %v748_v61, -33.21928  ;;  %v689_v34 = vadd.f32 %v673_v28, %v465_v48  ;;  %v332_v19 = vsub.f32 %v1546_v51, %v1235_v23  ;;  %v246_v17 = vand.u32 2147483647, %v230_v25 }
 0x108   :  { %v719_v16 = vmul.f32 1.442695, %v703_v56  ;;  %v765_v45 = vmax.f32 %v749_v6, -33.21928  ;;  %v734_v58 = vmax.f32 %v718_v26, -33.21928  ;;  %v233_v36 = vsub.f32 %v212_v42, %v1232_v41 }
 0x109   :  { %v1562_v49 = vpop.permute.xlu1 %299  ;;  %v705_v39 = vsub.f32 0.0, %v689_v34  ;;  %v720_v35 = vmul.f32 1.442695, %v704_v63  ;;  %v348_v21 = vand.u32 2147483647, %v332_v19  ;;  %v131_v57 = vsub.f32 %v102_v24, %v1242_v47 }
 0x10a   :  { %v330_v60 = vsub.f32 %v1562_v49, %v1235_v23  ;;  %v735_v38 = vmax.f32 %v719_v16, -33.21928  ;;  %v249_v18 = vand.u32 2147483647, %v233_v36 }
 0x10b   :  { %v721_v37 = vmul.f32 1.442695, %v705_v39  ;;  %v736_v0 = vmax.f32 %v720_v35, -33.21928  ;;  %vm147_vm12 = vcmp.gt.f32.partialorder %v131_v57, 0.0 }
 0x10c   :  { %v346_v49 = vand.u32 2147483647, %v330_v60 }
 0x10e   :  { %v204_v8 = vpop.permute.xlu1 %203  ;;  %v362_v31 = vmul.f32 %v346_v49, %v246_v17 }
 0x10f   :  { %v231_v1 = vsub.f32 %v204_v8, %v1232_v41 }
 0x110   :  { %v750_v40 = vmul.f32 %v734_v58, %v362_v31 }
 0x111   :  { %v247_v29 = vand.u32 2147483647, %v231_v1 }
 0x113   :  { %v87_v3 = vpop.permute.xlu1 %86  ;;  %v363_v10 = vmul.f32 %v347_v2, %v247_v29 }
 0x114   :  { %v128_v7 = vsub.f32 %v87_v3, %v1242_v47 }
 0x115   :  { %v751_v5 = vmul.f32 %v735_v38, %v363_v10 }
 0x116   :  { %vm144_vm10 = vcmp.gt.f32.partialorder %v128_v7, 0.0  ;;  %v766_v7 = vmax.f32 %v750_v40, -33.21928 }
 0x117   :  { %v780_v9 = vsel %vm144_vm10, %v764_v46, 0.0  ;;  %v767_v12 = vmax.f32 %v751_v5, -33.21928 }
 0x118   :  { %v208_v22 = vpop.permute.xlu1 %207  ;;  %v796_v52 = vadd.f32 %v1548_v54, %v780_v9 }
 0x119   :  { %v232_v62 = vsub.f32 %v208_v22, %v1232_v41  ;;  %v737_v41 = vmax.f32 %v721_v37, -33.21928  ;;  %v783_v50 = vsel %vm147_vm12, %v767_v12, 0.0 }
 0x11b   :  { %v248_v20 = vand.u32 2147483647, %v232_v62 }
 0x11d   :  { %v92_v8 = vpop.permute.xlu1 %91  ;;  %v364_v3 = vmul.f32 %v348_v21, %v248_v20 }
 0x11e   :  { %v129_v15 = vsub.f32 %v92_v8, %v1242_v47 }
 0x11f   :  { %v752_v13 = vmul.f32 %v736_v0, %v364_v3 }
 0x120   :  { %vm145_vm11 = vcmp.gt.f32.partialorder %v129_v15, 0.0 }
 0x121   :  { %v781_v43 = vsel %vm145_vm11, %v765_v45, 0.0  ;;  %v768_v22 = vmax.f32 %v752_v13, -33.21928 }
 0x122   :  { %v797_v55 = vadd.f32 %v796_v52, %v781_v43  ;;  %v312_v53 = vpop.permute.xlu1 %311 }
 0x123   :  { %v333_v51 = vsub.f32 %v312_v53, %v1235_v23 }
 0x125   :  { %v349_v54 = vand.u32 2147483647, %v333_v51 }
 0x127   :  { %v97_v14 = vpop.permute.xlu1 %96  ;;  %v365_v32 = vmul.f32 %v349_v54, %v249_v18 }
 0x128   :  { %v130_v11 = vsub.f32 %v97_v14, %v1242_v47 }
 0x129   :  { %v753_v44 = vmul.f32 %v737_v41, %v365_v32 }
 0x12a   :  { %vm146_vm13 = vcmp.gt.f32.partialorder %v130_v11, 0.0 }
 0x12b   :  { %v782_v23 = vsel %vm146_vm13, %v766_v7, 0.0  ;;  %v107_v27 = vpop.permute.xlu1 %106  ;;  %v769_v28 = vmax.f32 %v753_v44, -33.21928 }
 0x12c   :  { %v798_v61 = vadd.f32 %v797_v55, %v782_v23  ;;  %v132_v56 = vsub.f32 %v107_v27, %v1242_v47 }
 0x12e   :  { %vm148_vm14 = vcmp.gt.f32.partialorder %v132_v56, 0.0  ;;  %v799_v59 = vadd.f32 %v798_v61, %v783_v50 }
 0x12f   :  { %v784_v60 = vsel %vm148_vm14, %v768_v22, 0.0  ;;  %v112_v1 = vpop.permute.xlu1 %111 }
 0x130   :  { %v133_v4 = vsub.f32 %v112_v1, %v1242_v47  ;;  %v800_v33 = vadd.f32 %v799_v59, %v784_v60 }
 0x132   :  { %vm149_vm15 = vcmp.gt.f32.partialorder %v133_v4, 0.0 }
 0x133   :  { %v785_v30 = vsel %vm149_vm15, %v769_v28, 0.0 }
 0x134   :  { %v801_v25 = vadd.f32 %v800_v33, %v785_v30 }
 0x136   :  { %808 = vadd.xlane.f32.xlu0 %v801_v25 }
 0x1c3   :  { %v809_v46 = vpop.xlane.xlu0 %808 }
 0x1c4   :  { %v810_v6 = vrot.slane %v809_v46, 4 }
 0x1c6   :  { %v811_v16 = vadd.f32 %v810_v6, %v809_v46 }
 0x1c8   :  { %v812_v48 = vrot.slane %v811_v16, 2 }
 0x1ca   :  { %v813_v49 = vadd.f32 %v812_v48, %v811_v16 }
 0x1cc   :  { %v814_v29 = vrot.slane %v813_v49, 1 }
 0x1ce   :  { %v815_v42 = vadd.f32 %v814_v29, %v813_v49 }
 0x1d0   :  { %833 = vpush %v815_v42 }
 0x201   :  { %s834_s15 = spop %833 }
 0x202   :  { %v817_v9 = vstv %s834_s15 }
 0x203   :  { %818 = vst [vmem:[#allocation3] sm:$0xff] %v817_v9 }
 0x204   :  { %949 = shalt.err (!%p946_p4)
}
 0x205   :  { %s950_s19 = scalar_lea.hbm %s1644_s2, 128 }
 0x206   :  { %p951_p5 = scmp.ne.s32.totalorder %s1644_s2, %s950_s19  ;;  %p954_p6 = scmp.lt.u32.totalorder %s950_s19, %s1644_s2 }
 0x208   :  { %p956_p7 = pnand %p954_p6, %p951_p5 }
 0x20a   :  { %959 = shalt.err (!%p956_p7)
}
 0x20b   :  { %828 = dma.vmem_to_hbm [thread:$0]  %s826_s14, 128, %s1644_s2, [#allocation4]  }
 0x20c   :  { %960 = dma.done.wait [#allocation4], 128  }
 0x20d   :  { %961 = vsyncadd [#allocation4], 4294967168 }
 0x20e   :  { %832 = vsyncpa [#allocation4], 1 }

</bundles_post_ra>
